<compile_context>
chip_gen: v5e
topology: v5e:2x2
jax: 0.10.0
libtpu: 0.0.40
codegen_flags: <defaults>
</compile_context>

<pallas_src>
import jax
import jax.numpy as jnp
from jax.experimental import pallas as pl
from jax.experimental.pallas import tpu as pltpu


def _round_up(n: int, m: int) -> int:
    return ((n + m - 1) // m) * m


def _extrader_kernel(x_ref, w1_ref, b1_ref, w2_ref, b2_ref, o_ref):
    # x arrives as f32; cast to bf16 in-kernel (VPU work hidden under DMA/MXU).
    x = x_ref[...].astype(jnp.bfloat16)                              # [tb, in_dim]
    h = jnp.dot(x, w1_ref[...], preferred_element_type=jnp.float32)  # [tb, hid_p] f32
    h = h + b1_ref[...]                                              # f32 bias add
    h = jnp.tanh(jnp.tanh(h))                                        # Tanh() twice (EUP, f32)
    y = jnp.dot(h.astype(jnp.bfloat16), w2_ref[...],
                preferred_element_type=jnp.float32)                  # [tb, out_dim] f32
    o_ref[...] = (y + b2_ref[...]).astype(o_ref.dtype)               # masked store at true width


def prepare_extrader_params(w1, b1, w2, b2):
    """Pad the hidden dim to 128 and cast MXU operands to bf16.

    Call ONCE at parameter-creation time (not per forward call).
      w1: [in_dim, hid], b1: [hid], w2: [hid, out_dim], b2: [out_dim]
    """
    in_dim, hid = w1.shape
    out_dim = w2.shape[1]
    hid_p = _round_up(hid, 128)

    w1_p = jnp.pad(w1.astype(jnp.bfloat16), ((0, 0), (0, hid_p - hid)))
    b1_p = jnp.pad(b1.astype(jnp.float32).reshape(1, hid), ((0, 0), (0, hid_p - hid)))
    w2_p = jnp.pad(w2.astype(jnp.bfloat16), ((0, hid_p - hid), (0, 0)))
    b2_p = b2.astype(jnp.float32).reshape(1, out_dim)
    return w1_p, b1_p, w2_p, b2_p


def extrader_forward(x, w1_p, b1_p, w2_p, b2_p, *, tile_b=None):
    """Extrader forward pass as a single Pallas TPU kernel.

    x:    [B, in_dim] float32 (unpadded)
    w1_p: [in_dim, hid_p] bf16, b1_p: [1, hid_p] f32
    w2_p: [hid_p, out_dim] bf16, b2_p: [1, out_dim] f32
    returns [B, out_dim] float32
    """
    B, in_dim = x.shape
    hid_p = w1_p.shape[1]
    out_dim = w2_p.shape[1]

    if tile_b is None:
        # ~4 grid steps: >=2 steps/TC on v7x megacore, good BlockSpec
        # double-buffering on single-TC v5e/v6e.  Tune to 512+ there for big B.
        tile_b = _round_up(max(8, min(512, pl.cdiv(B, 4))), 8)
    tile_b = min(_round_up(max(8, tile_b), 8), _round_up(B, 8))

    grid = (pl.cdiv(B, tile_b),)

    cost = pl.CostEstimate(
        flops=2 * B * in_dim * hid_p + 2 * B * hid_p * out_dim,
        transcendentals=2 * B * hid_p,
        bytes_accessed=(B * in_dim * 4                        # x (f32, unpadded)
                        + in_dim * hid_p * 2 + hid_p * out_dim * 2   # weights bf16
                        + hid_p * 4 + out_dim * 4             # biases f32
                        + B * out_dim * 4),                    # output f32 (unpadded)
    )

    return pl.pallas_call(
        _extrader_kernel,
        out_shape=jax.ShapeDtypeStruct((B, out_dim), jnp.float32),
        grid_spec=pl.GridSpec(
            grid=grid,
            in_specs=[
                pl.BlockSpec((tile_b, in_dim), lambda i: (i, 0)),   # x tile (pipelined)
                pl.BlockSpec((in_dim, hid_p), lambda i: (0, 0)),    # W1 (resident)
                pl.BlockSpec((1, hid_p), lambda i: (0, 0)),         # b1
                pl.BlockSpec((hid_p, out_dim), lambda i: (0, 0)),   # W2 (resident)
                pl.BlockSpec((1, out_dim), lambda i: (0, 0)),       # b2
            ],
            out_specs=pl.BlockSpec((tile_b, out_dim), lambda i: (i, 0)),
        ),
        compiler_params=pltpu.CompilerParams(
            dimension_semantics=("parallel",),                      # batch axis -> megacore/2-TC
        ),
        cost_estimate=cost,
    )(x, w1_p, b1_p, w2_p, b2_p)


def _init_linear(key, fan_in, fan_out):
    """Deterministic init mirroring torch.nn.Linear's default U(-1/sqrt(fan_in), +)."""
    kw, kb = jax.random.split(key)
    bound = 1.0 / jnp.sqrt(jnp.asarray(fan_in, jnp.float32))
    # stored already transposed: [fan_in, fan_out] so the kernel does x @ W
    w = jax.random.uniform(kw, (fan_in, fan_out), jnp.float32, -bound, bound)
    b = jax.random.uniform(kb, (fan_out,), jnp.float32, -bound, bound)
    return w, b


if __name__ == "__main__":
    # Small shapes consistent with the module; batch large enough that the
    # default tile size gives a multi-step (4-step) pipelined grid.
    batch = 1024
    input_size = 32
    hidden_size = 64
    output_size = 16

    key = jax.random.PRNGKey(0)
    kx, k1, k2 = jax.random.split(key, 3)

    x = jax.random.normal(kx, (batch, input_size), jnp.float32)
    w1, b1 = _init_linear(k1, input_size, hidden_size)
    w2, b2 = _init_linear(k2, hidden_size, output_size)

    # Pad + cast weights exactly once (parameter-creation time, not per call).
    params = jax.tree_util.tree_map(jax.block_until_ready,
                                    prepare_extrader_params(w1, b1, w2, b2))

    fwd = jax.jit(extrader_forward)
    out = jax.block_until_ready(fwd(x, *params))

    # Pure-JAX f32 reference; kernel uses bf16 MXU inputs with f32 accumulation,
    # so compare with a bf16-appropriate tolerance.
    ref = jnp.tanh(jnp.tanh(x @ w1 + b1)) @ w2 + b2
    assert out.shape == (batch, output_size)
    assert jnp.allclose(out, ref, atol=2e-2, rtol=2e-2), float(jnp.max(jnp.abs(out - ref)))

    print("KERNEL_OK")
</pallas_src>

<mosaic_0001>
module attributes {stable_mosaic.version = 11 : i64} {
  func.func @_extrader_kernel(%arg0: i32, %arg1: memref<256x32xf32, #tpu.memory_space<vmem>>, %arg2: memref<32x128xbf16, #tpu.memory_space<vmem>>, %arg3: memref<1x128xf32, #tpu.memory_space<vmem>>, %arg4: memref<128x16xbf16, #tpu.memory_space<vmem>>, %arg5: memref<1x16xf32, #tpu.memory_space<vmem>>, %arg6: memref<256x16xf32, #tpu.memory_space<vmem>>) attributes {dimension_semantics = [#tpu.dimension_semantics<parallel>], iteration_bounds = array<i64: 4>, scalar_prefetch = 0 : i64, scratch_operands = 0 : i64, tpu.core_type = #tpu.core_type<tc>, window_params = [{transform_indices = @transform_0, window_bounds = array<i64: 256, 32>}, {pipeline_mode = #tpu.pipeline_mode<synchronous>, transform_indices = @transform_1, window_bounds = array<i64: 32, 128>}, {pipeline_mode = #tpu.pipeline_mode<synchronous>, transform_indices = @transform_2, window_bounds = array<i64: 1, 128>}, {pipeline_mode = #tpu.pipeline_mode<synchronous>, transform_indices = @transform_3, window_bounds = array<i64: 128, 16>}, {pipeline_mode = #tpu.pipeline_mode<synchronous>, transform_indices = @transform_4, window_bounds = array<i64: 1, 16>}, {transform_indices = @transform_5, window_bounds = array<i64: 256, 16>}]} {
    %c0 = arith.constant 0 : index
    %c0_0 = arith.constant 0 : index
    %0 = vector.load %arg1[%c0, %c0_0] : memref<256x32xf32, #tpu.memory_space<vmem>>, vector<256x32xf32>
    %1 = arith.truncf %0 : vector<256x32xf32> to vector<256x32xbf16>
    %c0_1 = arith.constant 0 : index
    %c0_2 = arith.constant 0 : index
    %2 = vector.load %arg2[%c0_1, %c0_2] : memref<32x128xbf16, #tpu.memory_space<vmem>>, vector<32x128xbf16>
    %cst = arith.constant dense<0.000000e+00> : vector<256x128xf32>
    %3 = tpu.matmul %1, %2, %cst {dimension_numbers = #tpu.dot_dimension_numbers<[1], [0], [0], [1], [0, 0, 1, 1], [], []>} : vector<256x32xbf16>, vector<32x128xbf16>, vector<256x128xf32> -> vector<256x128xf32>
    %c0_3 = arith.constant 0 : index
    %c0_4 = arith.constant 0 : index
    %4 = vector.load %arg3[%c0_3, %c0_4] : memref<1x128xf32, #tpu.memory_space<vmem>>, vector<1x128xf32>
    %5 = vector.broadcast %4 : vector<1x128xf32> to vector<256x128xf32>
    %6 = arith.addf %3, %5 : vector<256x128xf32>
    %7 = math.tanh %6 : vector<256x128xf32>
    %8 = math.tanh %7 : vector<256x128xf32>
    %9 = arith.truncf %8 : vector<256x128xf32> to vector<256x128xbf16>
    %c0_5 = arith.constant 0 : index
    %c0_6 = arith.constant 0 : index
    %10 = vector.load %arg4[%c0_5, %c0_6] : memref<128x16xbf16, #tpu.memory_space<vmem>>, vector<128x16xbf16>
    %cst_7 = arith.constant dense<0.000000e+00> : vector<256x16xf32>
    %11 = tpu.matmul %9, %10, %cst_7 {dimension_numbers = #tpu.dot_dimension_numbers<[1], [0], [0], [1], [0, 0, 1, 1], [], []>} : vector<256x128xbf16>, vector<128x16xbf16>, vector<256x16xf32> -> vector<256x16xf32>
    %c0_8 = arith.constant 0 : index
    %c0_9 = arith.constant 0 : index
    %12 = vector.load %arg5[%c0_8, %c0_9] : memref<1x16xf32, #tpu.memory_space<vmem>>, vector<1x16xf32>
    %13 = vector.broadcast %12 : vector<1x16xf32> to vector<256x16xf32>
    %14 = arith.addf %11, %13 : vector<256x16xf32>
    %c0_10 = arith.constant 0 : index
    %c0_11 = arith.constant 0 : index
    %15 = vector.load %arg6[%c0_10, %c0_11] : memref<256x16xf32, #tpu.memory_space<vmem>>, vector<256x16xf32>
    tpu.vector_store %arg6[%c0_10, %c0_11], %14 {strides = array<i32>} : memref<256x16xf32, #tpu.memory_space<vmem>>, vector<256x16xf32>,
    return
  }
  func.func @transform_0(%arg0: i32) -> (i32, i32) {
    %c0_i32 = arith.constant 0 : i32
    %c0_i32_0 = arith.constant 0 : i32
    return %arg0, %c0_i32 : i32, i32
  }
  func.func @transform_1(%arg0: i32) -> (i32, i32) {
    %c0_i32 = arith.constant 0 : i32
    %c0_i32_0 = arith.constant 0 : i32
    %c0_i32_1 = arith.constant 0 : i32
    return %c0_i32, %c0_i32_0 : i32, i32
  }
  func.func @transform_2(%arg0: i32) -> (i32, i32) {
    %c0_i32 = arith.constant 0 : i32
    %c0_i32_0 = arith.constant 0 : i32
    %c0_i32_1 = arith.constant 0 : i32
    return %c0_i32, %c0_i32_0 : i32, i32
  }
  func.func @transform_3(%arg0: i32) -> (i32, i32) {
    %c0_i32 = arith.constant 0 : i32
    %c0_i32_0 = arith.constant 0 : i32
    %c0_i32_1 = arith.constant 0 : i32
    return %c0_i32, %c0_i32_0 : i32, i32
  }
  func.func @transform_4(%arg0: i32) -> (i32, i32) {
    %c0_i32 = arith.constant 0 : i32
    %c0_i32_0 = arith.constant 0 : i32
    %c0_i32_1 = arith.constant 0 : i32
    return %c0_i32, %c0_i32_0 : i32, i32
  }
  func.func @transform_5(%arg0: i32) -> (i32, i32) {
    %c0_i32 = arith.constant 0 : i32
    %c0_i32_0 = arith.constant 0 : i32
    return %arg0, %c0_i32 : i32, i32
  }
}

</mosaic_0001>

<bundles_post_ra>
// kernel: extrader_forward.1
= control target key start
LH: loop header
LB: loop body
LE: loop exit
PB: predicated region body
PF: predicated region fallthrough
CT: control target
= control target key end

     0   :  { %s1024_s18 = smov 0   ;;  %s1268_s0 = inlined_call_operand.vmem [shape: f32[1024,32], index: 0, kind: input, shape index: {}]   ;;  %s1269_s1 = inlined_call_operand.vmem [shape: bf16[32,128], index: 1, kind: input, shape index: {}]   ;;  %s1270_s2 = inlined_call_operand.vmem [shape: f32[1,128], index: 2, kind: input, shape index: {}]   ;;  %s1271_s3 = inlined_call_operand.vmem [shape: bf16[128,16], index: 3, kind: input, shape index: {}]   ;;  %s1272_s4 = inlined_call_operand.vmem [shape: f32[1,16], index: 4, kind: input, shape index: {}]   ;;  %s1273_s5 = inlined_call_operand.vmem [shape: f32[1024,16], index: 5, kind: output, shape index: {}]  }
   0x1 LB: > { %s761_s19 = sadd.s32 4294967295, %s992_s18   ;;  %p765_p0 = scmp.ge.s32.totalorder %s992_s18, 1  ;;  %s992_s18 = sphi %s1024_s18, %s15_s18  }
   0x2   : > { %p188_p1 = scmp.lt.s32.totalorder %s992_s18, 5 }
   0x4   : > { %p189_p2 = pnand %p765_p0, %p188_p1 }
   0x5   : > { %s766_s22 = sshll.u32 (!%p189_p2), %s761_s19, 5 }
   0x6   : > { %192 = sbr.rel (%p189_p2) target bundleno = 554 (0x22a), region = 40  ;;  %p217_p3 = scmp.lt.s32.totalorder (!%p189_p2), %s766_s22, 127 }
   0xb   : > { %v829_v0 = vld [vmem:[%s1269_s1 + $0x8] sm:$0xff]  ;;  %v828_v1 = vld [vmem:[%s1269_s1] sm:$0xff]  ;;  %s1275_s22 = smov (!%p217_p3, %s766_s22), 127  ;;  %vm297_vm0 = vcmask 261120   ;;  %v837_v20 = vld [vmem:[%s1271_s3 + $0x38] sm:$0xff]  ;;  %vm672_vm1 = vcmask 130048  }
   0xc   : > { %352 = vmatpush.bf16.msra.mxu0 %v829_v0  ;;  %838 = vmatpush.bf16.msra.mxu3 %v829_v0  ;;  %s767_s25 = sshll.u32 %s1275_s22, 3  ;;  %v836_v23 = vld [vmem:[%s1271_s3 + $0x30] sm:$0xff]  ;;  %v835_v25 = vld [vmem:[%s1271_s3 + $0x28] sm:$0xff]  ;;  %v834_v29 = vld [vmem:[%s1271_s3 + $0x20] sm:$0xff] }
   0xd   : > { %s1046_s28 = scalar_lea.vmem %s1268_s0, %s767_s25  ;;  %583 = vmatpush.bf16.msra.mxu1 %v837_v20  ;;  %840 = vmatpush.bf16.msra.mxu2 %v837_v20  ;;  %v833_v30 = vld [vmem:[%s1271_s3 + $0x18] sm:$0xff]  ;;  %v832_v33 = vld [vmem:[%s1271_s3 + $0x10] sm:$0xff]  ;;  %v831_v35 = vld [vmem:[%s1271_s3 + $0x8] sm:$0xff]  ;;  %s1155_s29 = scalar_lea.vmem %s1273_s5, %s767_s25 }
   0xe   : > { %v229_v2 = vld [vmem:[%s1046_s28] sm:$0xff]  ;;  %v230_v3 = vld [vmem:[%s1046_s28 + $0x8] sm:$0xff]  ;;  %v231_v5 = vld [vmem:[%s1046_s28 + $0x10] sm:$0xff] }
   0xf   : > { %v261_v4 = vpack.c.bf16 %v230_v3, %v229_v2  ;;  %v232_v6 = vld [vmem:[%s1046_s28 + $0x18] sm:$0xff]  ;;  %v233_v8 = vld [vmem:[%s1046_s28 + $0x20] sm:$0xff]  ;;  %v234_v9 = vld [vmem:[%s1046_s28 + $0x28] sm:$0xff] }
  0x10   : > { %353 = vmatpush.bf16.msra.mxu0 %v828_v1  ;;  %839 = vmatpush.bf16.msra.mxu3 %v828_v1  ;;  %v262_v7 = vpack.c.bf16 %v232_v6, %v231_v5  ;;  %v263_v10 = vpack.c.bf16 %v234_v9, %v233_v8  ;;  %v235_v11 = vld [vmem:[%s1046_s28 + $0x30] sm:$0xff]  ;;  %v236_v12 = vld [vmem:[%s1046_s28 + $0x38] sm:$0xff]  ;;  %v237_v14 = vld [vmem:[%s1046_s28 + $0x40] sm:$0xff] }
  0x11   : > { %v264_v13 = vpack.c.bf16 %v236_v12, %v235_v11  ;;  %v238_v15 = vld [vmem:[%s1046_s28 + $0x48] sm:$0xff]  ;;  %v239_v17 = vld [vmem:[%s1046_s28 + $0x50] sm:$0xff]  ;;  %v240_v18 = vld [vmem:[%s1046_s28 + $0x58] sm:$0xff]  ;;  %584 = vmatpush.bf16.msra.mxu1 %v836_v23  ;;  %841 = vmatpush.bf16.msra.mxu2 %v836_v23 }
  0x12   : > { %v265_v16 = vpack.c.bf16 %v238_v15, %v237_v14  ;;  %v266_v19 = vpack.c.bf16 %v240_v18, %v239_v17  ;;  %v241_v21 = vld [vmem:[%s1046_s28 + $0x60] sm:$0xff]  ;;  %v242_v22 = vld [vmem:[%s1046_s28 + $0x68] sm:$0xff]  ;;  %v247_v26 = vld [vmem:[%s1046_s28 + $0x90] sm:$0xff] }
  0x13   : > { %778 = vmatmul.msk.bf16.vlgmr.msra.gmra.mxu0 %vm297_vm0, %v261_v4  ;;  %v267_v24 = vpack.c.bf16 %v242_v22, %v241_v21  ;;  %v248_v27 = vld [vmem:[%s1046_s28 + $0x98] sm:$0xff]  ;;  %v243_v31 = vld [vmem:[%s1046_s28 + $0x70] sm:$0xff]  ;;  %v249_v36 = vld [vmem:[%s1046_s28 + $0xa0] sm:$0xff] }
  0x14   : > { %v270_v28 = vpack.c.bf16 %v248_v27, %v247_v26  ;;  %v244_v32 = vld [vmem:[%s1046_s28 + $0x78] sm:$0xff]  ;;  %v250_v37 = vld [vmem:[%s1046_s28 + $0xa8] sm:$0xff]  ;;  %v830_v39 = vld [vmem:[%s1271_s3] sm:$0xff] }
  0x15   : > { %585 = vmatpush.bf16.msra.mxu1 %v835_v25  ;;  %842 = vmatpush.bf16.msra.mxu2 %v835_v25  ;;  %v268_v34 = vpack.c.bf16 %v244_v32, %v243_v31  ;;  %v271_v38 = vpack.c.bf16 %v250_v37, %v249_v36  ;;  %v245_v40 = vld [vmem:[%s1046_s28 + $0x80] sm:$0xff]  ;;  %v246_v41 = vld [vmem:[%s1046_s28 + $0x88] sm:$0xff]  ;;  %v251_v45 = vld [vmem:[%s1046_s28 + $0xb0] sm:$0xff] }
  0x16   : > { %787 = vmatmul.msk.bf16.vlgmr.msra.gmra.mxu3 %vm297_vm0, %v270_v28  ;;  %v269_v42 = vpack.c.bf16 %v246_v41, %v245_v40  ;;  %v1107_v43 = vld [vmem:[%s1270_s2] ss:$0 sm:$0xff]  ;;  %v252_v46 = vld [vmem:[%s1046_s28 + $0xb8] sm:$0xff]  ;;  %v254_v55 = vld [vmem:[%s1046_s28 + $0xc8] sm:$0xff] }
  0x17   : > { %v272_v47 = vpack.c.bf16 %v252_v46, %v251_v45  ;;  %v253_v54 = vld [vmem:[%s1046_s28 + $0xc0] sm:$0xff]  ;;  %v255_v2 = vld [vmem:[%s1046_s28 + $0xd0] sm:$0xff]  ;;  %v256_v3 = vld [vmem:[%s1046_s28 + $0xd8] sm:$0xff] }
  0x18   : > { %v273_v56 = vpack.c.bf16 %v254_v55, %v253_v54  ;;  %v274_v4 = vpack.c.bf16 %v256_v3, %v255_v2  ;;  %v257_v14 = vld [vmem:[%s1046_s28 + $0xe0] sm:$0xff]  ;;  %v258_v15 = vld [vmem:[%s1046_s28 + $0xe8] sm:$0xff]  ;;  %v259_v26 = vld [vmem:[%s1046_s28 + $0xf0] sm:$0xff] }
  0x19   : > { %586 = vmatpush.bf16.msra.mxu1 %v834_v29  ;;  %843 = vmatpush.bf16.msra.mxu2 %v834_v29  ;;  %v260_v27 = vld [vmem:[%s1046_s28 + $0xf8] sm:$0xff] }
  0x1a   : > { %v276_v28 = vpack.c.bf16 %v260_v27, %v259_v26 }
  0x1d   : > { %587 = vmatpush.bf16.msra.mxu1 %v833_v30  ;;  %844 = vmatpush.bf16.msra.mxu2 %v833_v30 }
  0x21   : > { %588 = vmatpush.bf16.msra.mxu1 %v832_v33  ;;  %845 = vmatpush.bf16.msra.mxu2 %v832_v33 }
  0x23   : > { %779 = vmatmul.msk.bf16.gmra.mxu0 %vm297_vm0, %v262_v7 }
  0x25   : > { %589 = vmatpush.bf16.msra.mxu1 %v831_v35  ;;  %846 = vmatpush.bf16.msra.mxu2 %v831_v35 }
  0x26   : > { %788 = vmatmul.msk.bf16.gmra.mxu3 %vm297_vm0, %v271_v38 }
  0x29   : > { %590 = vmatpush.bf16.msra.mxu1 %v830_v39  ;;  %847 = vmatpush.bf16.msra.mxu2 %v830_v39 }
  0x33   : > { %780 = vmatmul.msk.bf16.gmra.mxu0 %vm297_vm0, %v263_v10 }
  0x36   : > { %789 = vmatmul.msk.bf16.gmra.mxu3 %vm297_vm0, %v272_v47 }
  0x43   : > { %781 = vmatmul.msk.bf16.gmra.mxu0 %vm297_vm0, %v264_v13 }
  0x46   : > { %790 = vmatmul.msk.bf16.gmra.mxu3 %vm297_vm0, %v273_v56 }
  0x53   : > { %782 = vmatmul.msk.bf16.gmra.mxu0 %vm297_vm0, %v265_v16  ;;  %v275_v16 = vpack.c.bf16 %v258_v15, %v257_v14 }
  0x56   : > { %791 = vmatmul.msk.bf16.gmra.mxu3 %vm297_vm0, %v274_v4 }
  0x63   : > { %783 = vmatmul.msk.bf16.gmra.mxu0 %vm297_vm0, %v266_v19 }
  0x66   : > { %792 = vmatmul.msk.bf16.gmra.mxu3 %vm297_vm0, %v275_v16  ;;  %v1148_v16 = vld [vmem:[%s1272_s4] ss:$0 sm:$0xff] }
  0x73   : > { %784 = vmatmul.msk.bf16.gmra.mxu0 %vm297_vm0, %v267_v24 }
  0x76   : > { %793 = vmatmul.msk.bf16.gmra.mxu3 %vm297_vm0, %v276_v28 }
  0x83   : > { %785 = vmatmul.msk.bf16.gmra.mxu0 %vm297_vm0, %v268_v34 }
  0x90   : > { %v355_v44 = vpop.f32.mrf.mxu0 }
  0x91   : > { %v356_v48 = vadd.f32 %v1107_v43, %v355_v44 }
  0x93   : > { %786 = vmatmul.msk.bf16.gmra.mxu0 %vm297_vm0, %v269_v42  ;;  %858 = vtanh.f32 %v356_v48 }
  0x98   : > { %v357_v49 = vpop.f32.mrf.mxu0 }
  0x99   : > { %v358_v50 = vadd.f32 %v1107_v43, %v357_v49  ;;  %v859_v51 = vpop.eup %858  ;;  %v400_v55 = vpop.f32.mrf.mxu3 }
  0x9a   : > { %v401_v14 = vadd.f32 %v1107_v43, %v400_v55 }
  0x9b   : > { %860 = vtanh.f32 %v358_v50 }
  0x9c   : > { %862 = vtanh.f32 %v859_v51 }
  0xa0   : > { %v360_v52 = vpop.f32.mrf.mxu0 }
  0xa1   : > { %v861_v53 = vpop.eup %860  ;;  %v361_v57 = vadd.f32 %v1107_v43, %v360_v52 }
  0xa2   : > { %864 = vtanh.f32 %v861_v53  ;;  %v863_v58 = vpop.eup %862 }
  0xa3   : > { %866 = vtanh.f32 %v361_v57 }
  0xa8   : > { %v865_v59 = vpop.eup %864  ;;  %v362_v60 = vpop.f32.mrf.mxu0 }
  0xa9   : > { %v363_v61 = vadd.f32 %v1107_v43, %v362_v60  ;;  %v499_v62 = vpack.c.bf16 %v865_v59, %v863_v58  ;;  %v867_v63 = vpop.eup %866 }
  0xab   : > { %868 = vtanh.f32 %v363_v61  ;;  %591 = vmatmul.bf16.vlgmr.msra.gmra.mxu1 %v499_v62  ;;  %v402_v62 = vpop.f32.mrf.mxu3 }
  0xac   : > { %870 = vtanh.f32 %v867_v63  ;;  %v403_v15 = vadd.f32 %v1107_v43, %v402_v62 }
  0xb0   : > { %v365_v0 = vpop.f32.mrf.mxu0 }
  0xb1   : > { %v869_v1 = vpop.eup %868  ;;  %v366_v5 = vadd.f32 %v1107_v43, %v365_v0 }
  0xb2   : > { %872 = vtanh.f32 %v869_v1  ;;  %v871_v6 = vpop.eup %870 }
  0xb3   : > { %874 = vtanh.f32 %v366_v5  ;;  %v405_v4 = vpop.f32.mrf.mxu3 }
  0xb4   : > { %v406_v28 = vadd.f32 %v1107_v43, %v405_v4 }
  0xb8   : > { %v873_v7 = vpop.eup %872  ;;  %v367_v8 = vpop.f32.mrf.mxu0 }
  0xb9   : > { %v368_v9 = vadd.f32 %v1107_v43, %v367_v8  ;;  %v500_v10 = vpack.c.bf16 %v873_v7, %v871_v6  ;;  %v875_v11 = vpop.eup %874 }
  0xbb   : > { %876 = vtanh.f32 %v368_v9  ;;  %596 = vmatmul.bf16.gmra.mxu1 %v500_v10 }
  0xbc   : > { %878 = vtanh.f32 %v875_v11  ;;  %v407_v11 = vpop.f32.mrf.mxu3 }
  0xc0   : > { %v370_v12 = vpop.f32.mrf.mxu0 }
  0xc1   : > { %v877_v13 = vpop.eup %876  ;;  %v371_v17 = vadd.f32 %v1107_v43, %v370_v12 }
  0xc2   : > { %880 = vtanh.f32 %v877_v13  ;;  %v879_v18 = vpop.eup %878 }
  0xc3   : > { %882 = vtanh.f32 %v371_v17 }
  0xc4   : > { %v410_v17 = vpop.f32.mrf.mxu3 }
  0xc8   : > { %v881_v19 = vpop.eup %880  ;;  %v372_v20 = vpop.f32.mrf.mxu0 }
  0xc9   : > { %v373_v21 = vadd.f32 %v1107_v43, %v372_v20  ;;  %v501_v22 = vpack.c.bf16 %v881_v19, %v879_v18  ;;  %v883_v23 = vpop.eup %882 }
  0xcb   : > { %884 = vtanh.f32 %v373_v21  ;;  %601 = vmatmul.bf16.gmra.mxu1 %v501_v22 }
  0xcc   : > { %886 = vtanh.f32 %v883_v23  ;;  %v412_v26 = vpop.f32.mrf.mxu3 }
  0xd0   : > { %v375_v24 = vpop.f32.mrf.mxu0 }
  0xd1   : > { %v885_v25 = vpop.eup %884  ;;  %v376_v29 = vadd.f32 %v1107_v43, %v375_v24 }
  0xd2   : > { %888 = vtanh.f32 %v885_v25  ;;  %v887_v30 = vpop.eup %886 }
  0xd3   : > { %890 = vtanh.f32 %v376_v29  ;;  %v408_v29 = vadd.f32 %v1107_v43, %v407_v11 }
  0xd8   : > { %v889_v31 = vpop.eup %888  ;;  %v377_v32 = vpop.f32.mrf.mxu0 }
  0xd9   : > { %v378_v33 = vadd.f32 %v1107_v43, %v377_v32  ;;  %v502_v34 = vpack.c.bf16 %v889_v31, %v887_v30  ;;  %v891_v35 = vpop.eup %890 }
  0xdb   : > { %892 = vtanh.f32 %v378_v33  ;;  %606 = vmatmul.bf16.gmra.mxu1 %v502_v34 }
  0xdc   : > { %894 = vtanh.f32 %v891_v35  ;;  %v415_v35 = vpop.f32.mrf.mxu3 }
  0xe0   : > { %v380_v36 = vpop.f32.mrf.mxu0 }
  0xe1   : > { %v893_v37 = vpop.eup %892  ;;  %v381_v38 = vadd.f32 %v1107_v43, %v380_v36 }
  0xe2   : > { %896 = vtanh.f32 %v893_v37  ;;  %v895_v39 = vpop.eup %894 }
  0xe3   : > { %898 = vtanh.f32 %v381_v38 }
  0xe8   : > { %v897_v40 = vpop.eup %896  ;;  %v382_v41 = vpop.f32.mrf.mxu0 }
  0xe9   : > { %v383_v42 = vadd.f32 %v1107_v43, %v382_v41  ;;  %v503_v44 = vpack.c.bf16 %v897_v40, %v895_v39  ;;  %v899_v45 = vpop.eup %898  ;;  %v411_v40 = vadd.f32 %v1107_v43, %v410_v17  ;;  %v413_v41 = vadd.f32 %v1107_v43, %v412_v26 }
  0xeb   : > { %900 = vtanh.f32 %v383_v42  ;;  %611 = vmatmul.bf16.gmra.mxu1 %v503_v44  ;;  %v417_v42 = vpop.f32.mrf.mxu3 }
  0xec   : > { %902 = vtanh.f32 %v899_v45  ;;  %v418_v55 = vadd.f32 %v1107_v43, %v417_v42 }
  0xf0   : > { %v385_v46 = vpop.f32.mrf.mxu0 }
  0xf1   : > { %v901_v47 = vpop.eup %900  ;;  %v386_v48 = vadd.f32 %v1107_v43, %v385_v46 }
  0xf2   : > { %904 = vtanh.f32 %v901_v47  ;;  %v903_v49 = vpop.eup %902 }
  0xf3   : > { %906 = vtanh.f32 %v386_v48 }
  0xf8   : > { %v905_v50 = vpop.eup %904  ;;  %v387_v51 = vpop.f32.mrf.mxu0 }
  0xf9   : > { %v388_v52 = vadd.f32 %v1107_v43, %v387_v51  ;;  %v504_v53 = vpack.c.bf16 %v905_v50, %v903_v49  ;;  %v907_v54 = vpop.eup %906  ;;  %v420_v51 = vpop.f32.mrf.mxu3 }
  0xfb   : > { %908 = vtanh.f32 %v388_v52  ;;  %616 = vmatmul.bf16.gmra.mxu1 %v504_v53 }
  0xfc   : > { %910 = vtanh.f32 %v907_v54  ;;  %v416_v54 = vadd.f32 %v1107_v43, %v415_v35 }
 0x100   : > { %v390_v56 = vpop.f32.mrf.mxu0 }
 0x101   : > { %v909_v57 = vpop.eup %908  ;;  %v391_v58 = vadd.f32 %v1107_v43, %v390_v56 }
 0x102   : > { %912 = vtanh.f32 %v909_v57  ;;  %v911_v59 = vpop.eup %910 }
 0x103   : > { %914 = vtanh.f32 %v391_v58 }
 0x108   : > { %v913_v60 = vpop.eup %912  ;;  %v392_v61 = vpop.f32.mrf.mxu0 }
 0x109   : > { %v393_v63 = vadd.f32 %v1107_v43, %v392_v61  ;;  %v505_v0 = vpack.c.bf16 %v913_v60, %v911_v59  ;;  %v915_v1 = vpop.eup %914  ;;  %v422_v59 = vpop.f32.mrf.mxu3 }
 0x10a   : > { %v423_v4 = vadd.f32 %v1107_v43, %v422_v59 }
 0x10b   : > { %916 = vtanh.f32 %v393_v63  ;;  %621 = vmatmul.bf16.gmra.mxu1 %v505_v0 }
 0x10c   : > { %918 = vtanh.f32 %v915_v1 }
 0x110   : > { %v395_v2 = vpop.f32.mrf.mxu0 }
 0x111   : > { %v917_v3 = vpop.eup %916  ;;  %v396_v5 = vadd.f32 %v1107_v43, %v395_v2  ;;  %v421_v2 = vadd.f32 %v1107_v43, %v420_v51 }
 0x112   : > { %920 = vtanh.f32 %v917_v3  ;;  %v919_v6 = vpop.eup %918  ;;  %v425_v3 = vpop.f32.mrf.mxu3 }
 0x113   : > { %922 = vtanh.f32 %v396_v5 }
 0x118   : > { %v921_v7 = vpop.eup %920  ;;  %v397_v8 = vpop.f32.mrf.mxu0 }
 0x119   : > { %v398_v9 = vadd.f32 %v1107_v43, %v397_v8  ;;  %v506_v10 = vpack.c.bf16 %v921_v7, %v919_v6  ;;  %v923_v12 = vpop.eup %922 }
 0x11a   : > { %v427_v11 = vpop.f32.mrf.mxu3 }
 0x11b   : > { %924 = vtanh.f32 %v398_v9  ;;  %626 = vmatmul.bf16.gmra.mxu1 %v506_v10  ;;  %v428_v17 = vadd.f32 %v1107_v43, %v427_v11 }
 0x11c   : > { %926 = vtanh.f32 %v923_v12 }
 0x121   : > { %v925_v13 = vpop.eup %924 }
 0x122   : > { %928 = vtanh.f32 %v925_v13  ;;  %v927_v18 = vpop.eup %926 }
 0x123   : > { %930 = vtanh.f32 %v401_v14 }
 0x124   : > { %932 = vtanh.f32 %v403_v15  ;;  %v426_v15 = vadd.f32 %v1107_v43, %v425_v3 }
 0x128   : > { %v929_v19 = vpop.eup %928  ;;  %v592_v20 = vpop.f32.mrf.mxu1 }
 0x129   : > { %v593_v21 = vadd.f32 %v1148_v16, %v592_v20  ;;  %v507_v22 = vpack.c.bf16 %v929_v19, %v927_v18  ;;  %v931_v23 = vpop.eup %930  ;;  %v430_v20 = vpop.f32.mrf.mxu3 }
 0x12a   : > { %v933_v24 = vpop.eup %932  ;;  %934 = vtanh.f32 %v931_v23 }
 0x12b   : > { %673 = vst.msk [vmem:[%s1155_s29] sm:$0xff] %vm672_vm1, %v593_v21  ;;  %631 = vmatmul.bf16.vlgmr.msra.gmra.mxu2 %v507_v22  ;;  %936 = vtanh.f32 %v933_v24 }
 0x12c   : > { %938 = vtanh.f32 %v406_v28 }
 0x12d   : > { %940 = vtanh.f32 %v408_v29  ;;  %v431_v29 = vadd.f32 %v1107_v43, %v430_v20 }
 0x130   : > { %v594_v25 = vpop.f32.mrf.mxu1  ;;  %v935_v30 = vpop.eup %934 }
 0x131   : > { %v595_v27 = vadd.f32 %v1148_v16, %v594_v25  ;;  %v937_v31 = vpop.eup %936  ;;  %v432_v26 = vpop.f32.mrf.mxu3 }
 0x132   : > { %v508_v34 = vpack.c.bf16 %v937_v31, %v935_v30  ;;  %v939_v36 = vpop.eup %938  ;;  %v433_v30 = vadd.f32 %v1107_v43, %v432_v26 }
 0x133   : > { %674 = vst.msk [vmem:[%s1155_s29 + $0x8] sm:$0xff] %vm672_vm1, %v595_v27  ;;  %v941_v37 = vpop.eup %940  ;;  %942 = vtanh.f32 %v939_v36 }
 0x134   : > { %944 = vtanh.f32 %v941_v37 }
 0x135   : > { %946 = vtanh.f32 %v411_v40 }
 0x136   : > { %948 = vtanh.f32 %v413_v41 }
 0x138   : > { %v597_v32 = vpop.f32.mrf.mxu1 }
 0x139   : > { %v598_v33 = vadd.f32 %v1148_v16, %v597_v32  ;;  %v943_v44 = vpop.eup %942 }
 0x13a   : > { %v945_v45 = vpop.eup %944 }
 0x13b   : > { %675 = vst.msk [vmem:[%s1155_s29 + $0x10] sm:$0xff] %vm672_vm1, %v598_v33  ;;  %636 = vmatmul.bf16.gmra.mxu2 %v508_v34  ;;  %v509_v48 = vpack.c.bf16 %v945_v45, %v943_v44  ;;  %v947_v49 = vpop.eup %946 }
 0x13c   : > { %v949_v50 = vpop.eup %948  ;;  %950 = vtanh.f32 %v947_v49 }
 0x13d   : > { %952 = vtanh.f32 %v949_v50 }
 0x13e   : > { %954 = vtanh.f32 %v416_v54 }
 0x13f   : > { %956 = vtanh.f32 %v418_v55 }
 0x140   : > { %v599_v38 = vpop.f32.mrf.mxu1 }
 0x141   : > { %v600_v39 = vadd.f32 %v1148_v16, %v599_v38 }
 0x142   : > { %v951_v56 = vpop.eup %950 }
 0x143   : > { %676 = vst.msk [vmem:[%s1155_s29 + $0x18] sm:$0xff] %vm672_vm1, %v600_v39  ;;  %v953_v57 = vpop.eup %952 }
 0x144   : > { %v510_v61 = vpack.c.bf16 %v953_v57, %v951_v56  ;;  %v955_v62 = vpop.eup %954 }
 0x145   : > { %v957_v63 = vpop.eup %956  ;;  %958 = vtanh.f32 %v955_v62 }
 0x146   : > { %960 = vtanh.f32 %v957_v63 }
 0x147   : > { %962 = vtanh.f32 %v421_v2 }
 0x148   : > { %v602_v46 = vpop.f32.mrf.mxu1  ;;  %964 = vtanh.f32 %v423_v4 }
 0x149   : > { %v603_v47 = vadd.f32 %v1148_v16, %v602_v46 }
 0x14b   : > { %677 = vst.msk [vmem:[%s1155_s29 + $0x20] sm:$0xff] %vm672_vm1, %v603_v47  ;;  %641 = vmatmul.bf16.gmra.mxu2 %v509_v48  ;;  %v959_v5 = vpop.eup %958 }
 0x14c   : > { %v961_v6 = vpop.eup %960 }
 0x14d   : > { %v511_v9 = vpack.c.bf16 %v961_v6, %v959_v5  ;;  %v963_v10 = vpop.eup %962 }
 0x14e   : > { %v965_v12 = vpop.eup %964  ;;  %966 = vtanh.f32 %v963_v10 }
 0x14f   : > { %968 = vtanh.f32 %v965_v12 }
 0x150   : > { %v604_v52 = vpop.f32.mrf.mxu1  ;;  %970 = vtanh.f32 %v426_v15 }
 0x151   : > { %v605_v53 = vadd.f32 %v1148_v16, %v604_v52  ;;  %972 = vtanh.f32 %v428_v17 }
 0x153   : > { %678 = vst.msk [vmem:[%s1155_s29 + $0x28] sm:$0xff] %vm672_vm1, %v605_v53 }
 0x154   : > { %v967_v18 = vpop.eup %966 }
 0x155   : > { %v969_v19 = vpop.eup %968 }
 0x156   : > { %v512_v23 = vpack.c.bf16 %v969_v19, %v967_v18  ;;  %v971_v24 = vpop.eup %970 }
 0x157   : > { %v973_v25 = vpop.eup %972  ;;  %974 = vtanh.f32 %v971_v24 }
 0x158   : > { %v607_v58 = vpop.f32.mrf.mxu1  ;;  %976 = vtanh.f32 %v973_v25 }
 0x159   : > { %v608_v60 = vadd.f32 %v1148_v16, %v607_v58  ;;  %978 = vtanh.f32 %v431_v29 }
 0x15a   : > { %980 = vtanh.f32 %v433_v30 }
 0x15b   : > { %679 = vst.msk [vmem:[%s1155_s29 + $0x30] sm:$0xff] %vm672_vm1, %v608_v60  ;;  %646 = vmatmul.bf16.gmra.mxu2 %v510_v61 }
 0x15d   : > { %v975_v31 = vpop.eup %974 }
 0x15e   : > { %v977_v32 = vpop.eup %976 }
 0x15f   : > { %v513_v35 = vpack.c.bf16 %v977_v32, %v975_v31  ;;  %v979_v36 = vpop.eup %978 }
 0x160   : > { %v609_v0 = vpop.f32.mrf.mxu1  ;;  %v981_v37 = vpop.eup %980  ;;  %982 = vtanh.f32 %v979_v36 }
 0x161   : > { %v610_v1 = vadd.f32 %v1148_v16, %v609_v0  ;;  %984 = vtanh.f32 %v981_v37 }
 0x163   : > { %680 = vst.msk [vmem:[%s1155_s29 + $0x38] sm:$0xff] %vm672_vm1, %v610_v1 }
 0x166   : > { %v983_v39 = vpop.eup %982 }
 0x167   : > { %v985_v40 = vpop.eup %984 }
 0x168   : > { %v612_v7 = vpop.f32.mrf.mxu1  ;;  %v514_v44 = vpack.c.bf16 %v985_v40, %v983_v39 }
 0x169   : > { %v613_v8 = vadd.f32 %v1148_v16, %v612_v7 }
 0x16b   : > { %681 = vst.msk [vmem:[%s1155_s29 + $0x40] sm:$0xff] %vm672_vm1, %v613_v8  ;;  %651 = vmatmul.bf16.gmra.mxu2 %v511_v9 }
 0x170   : > { %v614_v13 = vpop.f32.mrf.mxu1 }
 0x171   : > { %v615_v14 = vadd.f32 %v1148_v16, %v614_v13 }
 0x173   : > { %682 = vst.msk [vmem:[%s1155_s29 + $0x48] sm:$0xff] %vm672_vm1, %v615_v14 }
 0x178   : > { %v617_v21 = vpop.f32.mrf.mxu1 }
 0x179   : > { %v618_v22 = vadd.f32 %v1148_v16, %v617_v21 }
 0x17b   : > { %683 = vst.msk [vmem:[%s1155_s29 + $0x50] sm:$0xff] %vm672_vm1, %v618_v22  ;;  %656 = vmatmul.bf16.gmra.mxu2 %v512_v23 }
 0x180   : > { %v619_v27 = vpop.f32.mrf.mxu1 }
 0x181   : > { %v620_v28 = vadd.f32 %v1148_v16, %v619_v27 }
 0x183   : > { %684 = vst.msk [vmem:[%s1155_s29 + $0x58] sm:$0xff] %vm672_vm1, %v620_v28 }
 0x188   : > { %v622_v33 = vpop.f32.mrf.mxu1 }
 0x189   : > { %v623_v34 = vadd.f32 %v1148_v16, %v622_v33 }
 0x18b   : > { %685 = vst.msk [vmem:[%s1155_s29 + $0x60] sm:$0xff] %vm672_vm1, %v623_v34  ;;  %661 = vmatmul.bf16.gmra.mxu2 %v513_v35 }
 0x190   : > { %v624_v43 = vpop.f32.mrf.mxu1 }
 0x191   : > { %v625_v38 = vadd.f32 %v1148_v16, %v624_v43 }
 0x193   : > { %686 = vst.msk [vmem:[%s1155_s29 + $0x68] sm:$0xff] %vm672_vm1, %v625_v38 }
 0x198   : > { %v627_v41 = vpop.f32.mrf.mxu1 }
 0x199   : > { %v628_v42 = vadd.f32 %v1148_v16, %v627_v41 }
 0x19b   : > { %687 = vst.msk [vmem:[%s1155_s29 + $0x70] sm:$0xff] %vm672_vm1, %v628_v42  ;;  %666 = vmatmul.bf16.gmra.mxu2 %v514_v44 }
 0x1a0   : > { %v629_v45 = vpop.f32.mrf.mxu1 }
 0x1a1   : > { %v630_v46 = vadd.f32 %v1148_v16, %v629_v45 }
 0x1a3   : > { %688 = vst.msk [vmem:[%s1155_s29 + $0x78] sm:$0xff] %vm672_vm1, %v630_v46 }
 0x1ae   : > { %v632_v47 = vpop.f32.mrf.mxu2 }
 0x1af   : > { %v633_v48 = vadd.f32 %v1148_v16, %v632_v47 }
 0x1b1   : > { %689 = vst.msk [vmem:[%s1155_s29 + $0x80] sm:$0xff] %vm672_vm1, %v633_v48 }
 0x1b6   : > { %v634_v49 = vpop.f32.mrf.mxu2 }
 0x1b7   : > { %v635_v50 = vadd.f32 %v1148_v16, %v634_v49 }
 0x1b9   : > { %690 = vst.msk [vmem:[%s1155_s29 + $0x88] sm:$0xff] %vm672_vm1, %v635_v50 }
 0x1be   : > { %v637_v51 = vpop.f32.mrf.mxu2 }
 0x1bf   : > { %v638_v52 = vadd.f32 %v1148_v16, %v637_v51 }
 0x1c1   : > { %691 = vst.msk [vmem:[%s1155_s29 + $0x90] sm:$0xff] %vm672_vm1, %v638_v52 }
 0x1c6   : > { %v639_v53 = vpop.f32.mrf.mxu2 }
 0x1c7   : > { %v640_v54 = vadd.f32 %v1148_v16, %v639_v53 }
 0x1c9   : > { %692 = vst.msk [vmem:[%s1155_s29 + $0x98] sm:$0xff] %vm672_vm1, %v640_v54 }
 0x1ce   : > { %v642_v55 = vpop.f32.mrf.mxu2 }
 0x1cf   : > { %v643_v56 = vadd.f32 %v1148_v16, %v642_v55 }
 0x1d1   : > { %693 = vst.msk [vmem:[%s1155_s29 + $0xa0] sm:$0xff] %vm672_vm1, %v643_v56 }
 0x1d6   : > { %v644_v57 = vpop.f32.mrf.mxu2 }
 0x1d7   : > { %v645_v58 = vadd.f32 %v1148_v16, %v644_v57 }
 0x1d9   : > { %694 = vst.msk [vmem:[%s1155_s29 + $0xa8] sm:$0xff] %vm672_vm1, %v645_v58 }
 0x1de   : > { %v647_v59 = vpop.f32.mrf.mxu2 }
 0x1df   : > { %v648_v60 = vadd.f32 %v1148_v16, %v647_v59 }
 0x1e1   : > { %695 = vst.msk [vmem:[%s1155_s29 + $0xb0] sm:$0xff] %vm672_vm1, %v648_v60 }
 0x1e6   : > { %v649_v61 = vpop.f32.mrf.mxu2 }
 0x1e7   : > { %v650_v62 = vadd.f32 %v1148_v16, %v649_v61 }
 0x1e9   : > { %696 = vst.msk [vmem:[%s1155_s29 + $0xb8] sm:$0xff] %vm672_vm1, %v650_v62 }
 0x1ee   : > { %v652_v63 = vpop.f32.mrf.mxu2 }
 0x1ef   : > { %v653_v0 = vadd.f32 %v1148_v16, %v652_v63 }
 0x1f1   : > { %697 = vst.msk [vmem:[%s1155_s29 + $0xc0] sm:$0xff] %vm672_vm1, %v653_v0 }
 0x1f6   : > { %v654_v1 = vpop.f32.mrf.mxu2 }
 0x1f7   : > { %v655_v2 = vadd.f32 %v1148_v16, %v654_v1 }
 0x1f9   : > { %698 = vst.msk [vmem:[%s1155_s29 + $0xc8] sm:$0xff] %vm672_vm1, %v655_v2 }
 0x1fe   : > { %v657_v3 = vpop.f32.mrf.mxu2 }
 0x1ff   : > { %v658_v4 = vadd.f32 %v1148_v16, %v657_v3 }
 0x201   : > { %699 = vst.msk [vmem:[%s1155_s29 + $0xd0] sm:$0xff] %vm672_vm1, %v658_v4 }
 0x206   : > { %v659_v5 = vpop.f32.mrf.mxu2 }
 0x207   : > { %v660_v6 = vadd.f32 %v1148_v16, %v659_v5 }
 0x209   : > { %700 = vst.msk [vmem:[%s1155_s29 + $0xd8] sm:$0xff] %vm672_vm1, %v660_v6 }
 0x20e   : > { %v662_v7 = vpop.f32.mrf.mxu2 }
 0x20f   : > { %v663_v8 = vadd.f32 %v1148_v16, %v662_v7 }
 0x211   : > { %701 = vst.msk [vmem:[%s1155_s29 + $0xe0] sm:$0xff] %vm672_vm1, %v663_v8 }
 0x216   : > { %v664_v9 = vpop.f32.mrf.mxu2 }
 0x217   : > { %v665_v10 = vadd.f32 %v1148_v16, %v664_v9 }
 0x219   : > { %702 = vst.msk [vmem:[%s1155_s29 + $0xe8] sm:$0xff] %vm672_vm1, %v665_v10 }
 0x21e   : > { %v667_v11 = vpop.f32.mrf.mxu2 }
 0x21f   : > { %v668_v12 = vadd.f32 %v1148_v16, %v667_v11 }
 0x221   : > { %703 = vst.msk [vmem:[%s1155_s29 + $0xf0] sm:$0xff] %vm672_vm1, %v668_v12 }
 0x226   : > { %v669_v13 = vpop.f32.mrf.mxu2 }
 0x227   : > { %v670_v14 = vadd.f32 %v1148_v16, %v669_v13 }
 0x229   : > { %704 = vst.msk [vmem:[%s1155_s29 + $0xf8] sm:$0xff] %vm672_vm1, %v670_v14 }
 0x22a PF: > { %s15_s18 = sadd.s32 1, %s992_s18  }
 0x22b   : > { %p12_p4 = scmp.ge.s32.totalorder %s15_s18, 6  }
 0x22d   :  { %14 = sbr.rel (!%p12_p4) target bundleno = 1 (0x1), region = 70 }

</bundles_post_ra>
